<compile_context>
chip_gen: v7x
topology: tpu7x:2x2x1
jax: 0.10.0
libtpu: 0.0.40
codegen_flags: <defaults>
</compile_context>

<pallas_src>
import functools

import jax
import jax.numpy as jnp
import numpy as np
from jax.experimental import pallas as pl
from jax.experimental.pallas import tpu as pltpu


def _loss_partial_kernel(pred_ref, gt_ref, out_ref, gg_ref, acc_ref, *, w, grad_dtype):
    """Process one (tb, C, H*W) plane-set of burst index n.

    Accumulates sum((p-g)^2 + |grad(p)-grad(g)|) across the inner n axis into a
    per-bb VMEM accumulator; writes the per-bb scalar partial at n == N-1.
    """
    n = pl.program_id(1)

    p_in = pred_ref[...]                       # (tb, C, HW), input dtype (N axis squeezed)
    g_in = gt_ref[...]                         # (tb, C, HW)
    p32 = p_in.astype(jnp.float32)
    g32 = g_in.astype(jnp.float32)
    pg = p_in.astype(grad_dtype)               # gradient-path operand (bf16 or f32)

    # Boundary masks, hoisted: built once per kernel body, shared by both grad calls.
    idx = jax.lax.broadcasted_iota(jnp.int32, p_in.shape, p_in.ndim - 1)
    mask_w0 = (idx % w) == 0                   # j == 0  -> left neighbor is zero-filled
    mask_h0 = idx < w                          # i == 0  -> up   neighbor is zero-filled

    def grad_l1(x):
        left = jnp.where(mask_w0, 0.0, pltpu.roll(x, shift=1, axis=x.ndim - 1))
        up = jnp.where(mask_h0, 0.0, pltpu.roll(x, shift=w, axis=x.ndim - 1))
        return jnp.abs(left - x) + jnp.abs(up - x)

    @pl.when(n == 0)
    def _init():
        # grad(gt) is identical for every n of this bb block: compute once, cache.
        gg_ref[...] = grad_l1(g_in.astype(grad_dtype))
        acc_ref[...] = jnp.zeros_like(acc_ref)

    diff = p32 - g32
    grad_diff = grad_l1(pg) - gg_ref[...]
    # Fused contribution: only the sum of the two loss terms is ever used.
    contrib = diff * diff + jnp.abs(grad_diff).astype(jnp.float32)
    # Leading-axis reduction = pure VPU vreg adds; no per-step cross-lane reduce.
    acc_ref[...] = acc_ref[...] + jnp.sum(contrib, axis=0)

    @pl.when(n == pl.num_programs(1) - 1)
    def _finalize():
        # Single cross-lane/sublane reduce per bb, in the epilogue only.
        out_ref[...] = jnp.reshape(jnp.sum(acc_ref[...]), (1, 1, 1))


def _partial_sums(pred_flat, gt_flat, tb, w):
    """Per-bb partial sums of the fused loss contribution.

    pred_flat: [B, N, C, H*W],  gt_flat: [B, C, H*W]  ->  [gb, 1, 1] float32
    """
    B, N, C, HW = pred_flat.shape
    gb = B // tb

    # bf16 gradient path only when inputs are bf16 (v6e/v7x native VALU); f32 otherwise.
    grad_dtype = jnp.bfloat16 if pred_flat.dtype == jnp.bfloat16 else jnp.float32

    itemsize = jnp.dtype(pred_flat.dtype).itemsize
    elems = B * N * C * HW
    cost = pl.CostEstimate(
        flops=18 * elems,
        transcendentals=0,
        bytes_accessed=int(pred_flat.size * itemsize + gt_flat.size * itemsize + gb * 4),
    )

    kernel = functools.partial(_loss_partial_kernel, w=w, grad_dtype=grad_dtype)

    return pl.pallas_call(
        kernel,
        out_shape=jax.ShapeDtypeStruct((gb, 1, 1), jnp.float32),
        grid=(gb, N),
        in_specs=[
            # N axis squeezed out of the kernel ref; minor axis is lane-dense H*W.
            pl.BlockSpec((tb, pl.Squeezed(), C, HW), lambda bb, n: (bb, n, 0, 0)),
            # gt block index depends only on bb -> DMA'd once per bb, reused for all N.
            pl.BlockSpec((tb, C, HW), lambda bb, n: (bb, 0, 0)),
        ],
        out_specs=pl.BlockSpec((1, 1, 1), lambda bb, n: (bb, 0, 0)),
        scratch_shapes=[
            pltpu.VMEM((tb, C, HW), grad_dtype),   # cached grad(gt) for this bb
            pltpu.VMEM((C, HW), jnp.float32),      # per-bb running f32 accumulator
        ],
        compiler_params=pltpu.CompilerParams(
            # bb blocks are fully independent (per-bb output) -> parallel across
            # TensorCores on v7x; n carries the accumulator -> arbitrary.
            dimension_semantics=("parallel", "arbitrary"),
            vmem_limit_bytes=40 * 1024 * 1024,
        ),
        cost_estimate=cost,
    )(pred_flat, gt_flat)


def loss_anneal(global_step, pred_i, ground_truth, alpha=0.9998, beta=100.0):
    """Pallas implementation of LossAnneal.forward.

    pred_i:       [B, N, C, H, W]
    ground_truth: [B, C, H, W]
    """
    B, N, C, H, W = pred_i.shape
    assert ground_truth.shape == (B, C, H, W)
    HW = H * W

    # Lane-dense layout: flatten (H, W) into the minor axis.  Row-major reshape
    # of contiguous arrays is metadata-only at the XLA level.
    pred_flat = pred_i.reshape(B, N, C, HW)
    gt_flat = ground_truth.reshape(B, C, HW)

    itemsize = jnp.dtype(pred_i.dtype).itemsize
    plane_bytes = C * HW * itemsize
    # ~2 MiB block target: >=85% of roofline already at ~1 MiB tiles, and small
    # enough to be safe inside v7x's 64 MiB VMEM (comfortable on v5e/v6e).
    target_block_bytes = 2 * 1024 * 1024
    divisors = [d for d in range(1, B + 1) if B % d == 0]
    fitting = [d for d in divisors if d * plane_bytes <= target_block_bytes]
    if fitting:
        # Prefer >= 2 batch blocks so the parallel bb axis can split across the
        # two TensorCores of a v7x chip.
        multi = [d for d in fitting if B // d >= 2]
        tb = max(multi) if multi else max(fitting)
    else:
        # TODO(synk): H-tiled path with a 1-row halo for planes larger than the
        # block target instead of full-plane fallback.
        tb = 1

    partials = _partial_sums(pred_flat, gt_flat, tb, W)
    total = jnp.sum(partials)

    denom = jnp.float32(N * B * C * H * W)
    if isinstance(global_step, (int, np.integer)):
        scale = jnp.float32(float(beta) * (float(alpha) ** int(global_step)))
    else:  # traced / device scalar global_step
        scale = jnp.float32(beta) * jnp.power(
            jnp.float32(alpha), jnp.asarray(global_step, jnp.float32))
    return (scale * (total / denom)).astype(jnp.float32)


# ----------------------------- pure-JAX reference -----------------------------

def _ref_tensor_gradient(img, L1=True):
    nd = img.ndim
    pad_w = [(0, 0)] * (nd - 1) + [(1, 0)]
    pad_h = [(0, 0)] * (nd - 2) + [(1, 0), (0, 0)]
    shift_w = jnp.pad(img, pad_w)[..., :-1]
    shift_h = jnp.pad(img, pad_h)[..., :-1, :]
    dw = shift_w - img
    dh = shift_h - img
    if L1:
        return jnp.abs(dw) + jnp.abs(dh)
    return jnp.sqrt(dw * dw + dh * dh)


def _ref_loss_basic(pred, gt):
    l2 = jnp.mean((pred - gt) ** 2)
    l1 = jnp.mean(jnp.abs(_ref_tensor_gradient(pred) - _ref_tensor_gradient(gt)))
    return l2 + l1


def _ref_loss_anneal(global_step, pred_i, gt, alpha=0.9998, beta=100.0):
    N = pred_i.shape[1]
    loss = jnp.float32(0.0)
    for i in range(N):
        loss = loss + _ref_loss_basic(pred_i[:, i], gt)
    loss = loss / N
    return beta * (alpha ** int(global_step)) * loss


if __name__ == "__main__":
    key = jax.random.PRNGKey(0)
    k1, k2 = jax.random.split(key)

    B, N, C, H, W = 2, 4, 3, 16, 16
    pred_i = jax.random.normal(k1, (B, N, C, H, W), dtype=jnp.float32)
    gt = jax.random.normal(k2, (B, C, H, W), dtype=jnp.float32)
    global_step = 1000  # LossAnneal params: alpha=0.9998, beta=100 (defaults)

    out = jax.block_until_ready(loss_anneal(global_step, pred_i, gt))
    ref = _ref_loss_anneal(global_step, pred_i, gt)

    np.testing.assert_allclose(np.asarray(out), np.asarray(ref),
                               rtol=1e-5, atol=1e-5)
    print("KERNEL_OK")
</pallas_src>

<mosaic_0001>
module attributes {stable_mosaic.version = 11 : i64} {
  func.func @_loss_partial_kernel(%arg0: i32, %arg1: i32, %arg2: memref<1x1x3x256xf32, #tpu.memory_space<vmem>>, %arg3: memref<1x3x256xf32, #tpu.memory_space<vmem>>, %arg4: memref<1x1x1xf32, #tpu.memory_space<vmem>>, %arg5: memref<1x3x256xf32, #tpu.memory_space<vmem>>, %arg6: memref<3x256xf32, #tpu.memory_space<vmem>>) attributes {dimension_semantics = [#tpu.dimension_semantics<parallel>, #tpu.dimension_semantics<arbitrary>], iteration_bounds = array<i64: 2, 4>, scalar_prefetch = 0 : i64, scratch_operands = 2 : i64, tpu.core_type = #tpu.core_type<tc>, window_params = [{transform_indices = @transform_0, window_bounds = array<i64: 1, 1, 3, 256>}, {transform_indices = @transform_1, window_bounds = array<i64: 1, 3, 256>}, {transform_indices = @transform_2, window_bounds = array<i64: 1, 1, 1>}]} {
    %c0 = arith.constant 0 : index
    %c0_0 = arith.constant 0 : index
    %c0_1 = arith.constant 0 : index
    %c0_2 = arith.constant 0 : index
    %0 = vector.load %arg2[%c0, %c0_0, %c0_1, %c0_2] : memref<1x1x3x256xf32, #tpu.memory_space<vmem>>, vector<1x1x3x256xf32>
    %1 = vector.shape_cast %0 : vector<1x1x3x256xf32> to vector<1x3x256xf32>
    %c0_3 = arith.constant 0 : index
    %c0_4 = arith.constant 0 : index
    %c0_5 = arith.constant 0 : index
    %2 = vector.load %arg3[%c0_3, %c0_4, %c0_5] : memref<1x3x256xf32, #tpu.memory_space<vmem>>, vector<1x3x256xf32>
    %3 = tpu.iota {dimensions = array<i32: 2>} : vector<1x3x256xi32>
    %c16_i32 = arith.constant 16 : i32
    %c0_i32 = arith.constant 0 : i32
    %4 = arith.cmpi eq, %c16_i32, %c0_i32 : i32
    %c1_i32 = arith.constant 1 : i32
    %5 = arith.select %4, %c1_i32, %c16_i32 : i32
    %6 = vector.broadcast %5 : i32 to vector<1x3x256xi32>
    %7 = arith.remsi %3, %6 : vector<1x3x256xi32>
    %c0_i32_6 = arith.constant 0 : i32
    %8 = vector.broadcast %c0_i32_6 : i32 to vector<1x3x256xi32>
    %9 = arith.cmpi ne, %7, %8 : vector<1x3x256xi32>
    %c0_i32_7 = arith.constant 0 : i32
    %10 = vector.broadcast %c0_i32_7 : i32 to vector<1x3x256xi32>
    %11 = arith.cmpi slt, %7, %10 : vector<1x3x256xi32>
    %c0_i32_8 = arith.constant 0 : i32
    %12 = arith.cmpi slt, %5, %c0_i32_8 : i32
    %13 = vector.broadcast %12 : i1 to vector<1x3x256xi1>
    %14 = vector.broadcast %13 : vector<1x3x256xi1> to vector<1x3x256xi1>
    %15 = arith.xori %11, %14 : vector<1x3x256xi1>
    %16 = arith.andi %15, %9 : vector<1x3x256xi1>
    %17 = vector.broadcast %5 : i32 to vector<1x3x256xi32>
    %18 = arith.addi %7, %17 : vector<1x3x256xi32>
    %19 = arith.select %16, %18, %7 : vector<1x3x256xi1>, vector<1x3x256xi32>
    %c0_i32_9 = arith.constant 0 : i32
    %20 = vector.broadcast %c0_i32_9 : i32 to vector<1x3x256xi32>
    %21 = arith.cmpi eq, %19, %20 : vector<1x3x256xi32>
    %c16_i32_10 = arith.constant 16 : i32
    %22 = vector.broadcast %c16_i32_10 : i32 to vector<1x3x256xi32>
    %23 = arith.cmpi slt, %3, %22 : vector<1x3x256xi32>
    %c0_i32_11 = arith.constant 0 : i32
    %24 = arith.cmpi eq, %arg1, %c0_i32_11 : i32
    %25 = arith.extui %24 : i1 to i32
    %c0_i32_12 = arith.constant 0 : i32
    %26 = arith.cmpi ne, %25, %c0_i32_12 : i32
    scf.if %26 {
      %c1_i32_25 = arith.constant 1 : i32
      %51 = tpu.dynamic_rotate %2 by %c1_i32_25 dim 2 : vector<1x3x256xf32>, i32 -> vector<1x3x256xf32>
      %cst_26 = arith.constant 0.000000e+00 : f32
      %52 = vector.broadcast %cst_26 : f32 to vector<1x3x256xf32>
      %53 = arith.select %21, %52, %51 : vector<1x3x256xi1>, vector<1x3x256xf32>
      %c16_i32_27 = arith.constant 16 : i32
      %54 = tpu.dynamic_rotate %2 by %c16_i32_27 dim 2 : vector<1x3x256xf32>, i32 -> vector<1x3x256xf32>
      %cst_28 = arith.constant 0.000000e+00 : f32
      %55 = vector.broadcast %cst_28 : f32 to vector<1x3x256xf32>
      %56 = arith.select %23, %55, %54 : vector<1x3x256xi1>, vector<1x3x256xf32>
      %57 = arith.subf %53, %2 : vector<1x3x256xf32>
      %58 = math.absf %57 : vector<1x3x256xf32>
      %59 = arith.subf %56, %2 : vector<1x3x256xf32>
      %60 = math.absf %59 : vector<1x3x256xf32>
      %61 = arith.addf %58, %60 : vector<1x3x256xf32>
      %c0_29 = arith.constant 0 : index
      %c0_30 = arith.constant 0 : index
      %c0_31 = arith.constant 0 : index
      %62 = vector.load %arg5[%c0_29, %c0_30, %c0_31] : memref<1x3x256xf32, #tpu.memory_space<vmem>>, vector<1x3x256xf32>
      tpu.vector_store %arg5[%c0_29, %c0_30, %c0_31], %61 {strides = array<i32>} : memref<1x3x256xf32, #tpu.memory_space<vmem>>, vector<1x3x256xf32>,
      %cst_32 = arith.constant 0.000000e+00 : f32
      %63 = vector.broadcast %cst_32 : f32 to vector<3x256xf32>
      %c0_33 = arith.constant 0 : index
      %c0_34 = arith.constant 0 : index
      %64 = vector.load %arg6[%c0_33, %c0_34] : memref<3x256xf32, #tpu.memory_space<vmem>>, vector<3x256xf32>
      tpu.vector_store %arg6[%c0_33, %c0_34], %63 {strides = array<i32>} : memref<3x256xf32, #tpu.memory_space<vmem>>, vector<3x256xf32>,
    } else {
    }
    %27 = arith.subf %1, %2 : vector<1x3x256xf32>
    %c1_i32_13 = arith.constant 1 : i32
    %28 = tpu.dynamic_rotate %1 by %c1_i32_13 dim 2 : vector<1x3x256xf32>, i32 -> vector<1x3x256xf32>
    %cst = arith.constant 0.000000e+00 : f32
    %29 = vector.broadcast %cst : f32 to vector<1x3x256xf32>
    %30 = arith.select %21, %29, %28 : vector<1x3x256xi1>, vector<1x3x256xf32>
    %c16_i32_14 = arith.constant 16 : i32
    %31 = tpu.dynamic_rotate %1 by %c16_i32_14 dim 2 : vector<1x3x256xf32>, i32 -> vector<1x3x256xf32>
    %cst_15 = arith.constant 0.000000e+00 : f32
    %32 = vector.broadcast %cst_15 : f32 to vector<1x3x256xf32>
    %33 = arith.select %23, %32, %31 : vector<1x3x256xi1>, vector<1x3x256xf32>
    %34 = arith.subf %30, %1 : vector<1x3x256xf32>
    %35 = math.absf %34 : vector<1x3x256xf32>
    %36 = arith.subf %33, %1 : vector<1x3x256xf32>
    %37 = math.absf %36 : vector<1x3x256xf32>
    %38 = arith.addf %35, %37 : vector<1x3x256xf32>
    %c0_16 = arith.constant 0 : index
    %c0_17 = arith.constant 0 : index
    %c0_18 = arith.constant 0 : index
    %39 = vector.load %arg5[%c0_16, %c0_17, %c0_18] : memref<1x3x256xf32, #tpu.memory_space<vmem>>, vector<1x3x256xf32>
    %40 = arith.subf %38, %39 : vector<1x3x256xf32>
    %41 = arith.mulf %27, %27 : vector<1x3x256xf32>
    %42 = math.absf %40 : vector<1x3x256xf32>
    %43 = arith.addf %41, %42 : vector<1x3x256xf32>
    %c0_19 = arith.constant 0 : index
    %c0_20 = arith.constant 0 : index
    %44 = vector.load %arg6[%c0_19, %c0_20] : memref<3x256xf32, #tpu.memory_space<vmem>>, vector<3x256xf32>
    %cst_21 = arith.constant dense<0.000000e+00> : vector<3x256xf32>
    %45 = vector.multi_reduction <add>, %43, %cst_21 [0] : vector<1x3x256xf32> to vector<3x256xf32>
    %46 = arith.addf %44, %45 : vector<3x256xf32>
    %c0_22 = arith.constant 0 : index
    %c0_23 = arith.constant 0 : index
    %47 = vector.load %arg6[%c0_22, %c0_23] : memref<3x256xf32, #tpu.memory_space<vmem>>, vector<3x256xf32>
    tpu.vector_store %arg6[%c0_22, %c0_23], %46 {strides = array<i32>} : memref<3x256xf32, #tpu.memory_space<vmem>>, vector<3x256xf32>,
    %c3_i32 = arith.constant 3 : i32
    %48 = arith.cmpi eq, %arg1, %c3_i32 : i32
    %49 = arith.extui %48 : i1 to i32
    %c0_i32_24 = arith.constant 0 : i32
    %50 = arith.cmpi ne, %49, %c0_i32_24 : i32
    scf.if %50 {
      %c0_25 = arith.constant 0 : index
      %c0_26 = arith.constant 0 : index
      %51 = vector.load %arg6[%c0_25, %c0_26] : memref<3x256xf32, #tpu.memory_space<vmem>>, vector<3x256xf32>
      %52 = vector.shape_cast %51 : vector<3x256xf32> to vector<1x3x256xf32>
      %cst_27 = arith.constant dense<0.000000e+00> : vector<1xf32>
      %53 = vector.multi_reduction <add>, %52, %cst_27 [1, 2] : vector<1x3x256xf32> to vector<1xf32>
      %54 = vector.shape_cast %53 : vector<1xf32> to vector<1x1x1xf32>
      %55 = vector.extract %54[0, 0, 0] : f32 from vector<1x1x1xf32>
      %56 = vector.broadcast %55 : f32 to vector<1x1x1xf32>
      %c0_28 = arith.constant 0 : index
      %c0_29 = arith.constant 0 : index
      %c0_30 = arith.constant 0 : index
      %57 = vector.load %arg4[%c0_28, %c0_29, %c0_30] : memref<1x1x1xf32, #tpu.memory_space<vmem>>, vector<1x1x1xf32>
      tpu.vector_store %arg4[%c0_28, %c0_29, %c0_30], %56 {strides = array<i32>} : memref<1x1x1xf32, #tpu.memory_space<vmem>>, vector<1x1x1xf32>,
    } else {
    }
    return
  }
  func.func @transform_0(%arg0: i32, %arg1: i32) -> (i32, i32, i32, i32) {
    %c0_i32 = arith.constant 0 : i32
    %c0_i32_0 = arith.constant 0 : i32
    %c0_i32_1 = arith.constant 0 : i32
    return %arg0, %arg1, %c0_i32, %c0_i32_0 : i32, i32, i32, i32
  }
  func.func @transform_1(%arg0: i32, %arg1: i32) -> (i32, i32, i32) {
    %c0_i32 = arith.constant 0 : i32
    %c0_i32_0 = arith.constant 0 : i32
    %c0_i32_1 = arith.constant 0 : i32
    return %arg0, %c0_i32, %c0_i32_0 : i32, i32, i32
  }
  func.func @transform_2(%arg0: i32, %arg1: i32) -> (i32, i32, i32) {
    %c0_i32 = arith.constant 0 : i32
    %c0_i32_0 = arith.constant 0 : i32
    %c0_i32_1 = arith.constant 0 : i32
    return %arg0, %c0_i32, %c0_i32_0 : i32, i32, i32
  }
}

</mosaic_0001>

<bundles_post_ra>
// kernel: tpu_custom_call.1
= control target key start
LH: loop header
LB: loop body
LE: loop exit
PB: predicated region body
PF: predicated region fallthrough
CT: control target
= control target key end

     0   :  { %s535_s9 = smov 0   ;;  %s537_s10 = smov 0   ;;  %s657_s0 = inlined_call_operand.vmem [shape: f32[2,4,3,256], index: 0, kind: input, shape index: {}]   ;;  %s658_s1 = inlined_call_operand.vmem [shape: f32[2,3,256], index: 1, kind: input, shape index: {}]   ;;  %s659_s2 = inlined_call_operand.vmem [shape: f32[2,1,1], index: 2, kind: output, shape index: {}]  }
   0x1   :  { %s539_s11 = smov 0   ;;  %s541_s12 = smov 0  }
   0x2   :  { %s543_s13 = smov 0  }
   0x3 LB: > { %s21_s14 = sadd.s32 1, %s505_s11  ;;  %s24_s15 = sadd.s32 1, %s509_s12  ;;  %s513_s13 = sphi %s543_s13, %s12_s13   ;;  %s509_s12 = sphi %s541_s12, %s667_s12   ;;  %s505_s11 = sphi %s539_s11, %s666_s11   ;;  %s501_s10 = sphi %s537_s10, %s665_s10   ;;  %s497_s9 = sphi %s535_s9, %s664_s9  }
   0x4   : > { %p22_p0 = scmp.ge.s32.totalorder %s21_s14, 4  ;;  %p415_p1 = scmp.ge.s32.totalorder %s513_s13, 1 }
   0x5   : > { %p140_p2 = scmp.lt.s32.totalorder %s513_s13, 9 }
   0x6   : > { %s669_s14 = smov (%p22_p0, %s21_s14), 0  ;;  %s671_s15 = smov (!%p22_p0, %s24_s15), %s509_s12 }
   0x7   : > { %p141_p3 = pnand %p415_p1, %p140_p2  ;;  %p26_p4 = scmp.ge.s32.totalorder %s671_s15, 2 }
   0x8   : > { %p169_p5 = scmp.lt.s32.totalorder (!%p141_p3), %s501_s10, 1  ;;  %p171_p6 = scmp.lt.s32.totalorder (!%p141_p3), %s497_s9, 3  ;;  %v188_v0 = vlaneseq (!%p141_p3) }
   0x9   : > { %s673_s15 = smov (%p26_p4, %s671_s15), 0  ;;  %144 = sbr.rel (%p141_p3) target bundleno = 509 (0x1fd), region = 28 }
   0xa   : > { %v570_v1 = vand.u32 (!%p141_p3), 127, %v188_v0  ;;  %p421_p7 = scmp.ne.s32.totalorder (!%p141_p3), %s497_s9, 0 }
   0xc   : > { %v190_v2 = vadd.s32 (!%p141_p3), 128, %v570_v1  ;;  %v195_v3 = vand.u32 (!%p141_p3), 15, %v570_v1  ;;  %vm217_vm0 = vcmp.lt.s32.totalorder (!%p141_p3), %v570_v1, 16 }
   0xe   : > { %v202_v5 = vand.u32 (!%p141_p3), 15, %v190_v2  ;;  %vm586_vm1 = vcmp.eq.s32.totalorder (!%p141_p3), %v195_v3, 0 }
  0x10   : > { %s675_s10 = smov (!%p169_p5, %s501_s10), 1  ;;  %vm593_vm2 = vcmp.eq.s32.totalorder %v202_v5, 0  ;;  %s515_s30 = smov (!%p421_p7), 16   ;;  %v517_v10 = vmov (!%p421_p7), 0.0   ;;  %vm230_vm3 = vcmp.lt.s32.totalorder (!%p421_p7), %v570_v1, 1 }
  0x11   : > { %s172_s16 = scalar_select %p171_p6, %s497_s9, 3 }
  0x12   : > { %s417_s17 = sshll.u32 %s675_s10, 3  ;;  %s185_s20 = scalar_lea.vmem %s659_s2, %s675_s10  ;;  %258 = vst [vmem:[#allocation3] sm:$0x77] (!%p421_p7), %v517_v10 }
  0x13   : > { %s416_s21 = sshll.u32 %s172_s16, 1  ;;  %s182_s24 = scalar_lea.vmem %s658_s1, %s417_s17 }
  0x14   : > { %s175_s25 = sadd.s32 %s417_s17, %s416_s21  ;;  %v584_v4 = vld [vmem:[%s182_s24] sm:$0x77]  ;;  %222 = sbr.rel (%p421_p7) target bundleno = 152 (0x98), region = 32 }
  0x15   : > { %s418_s26 = sshll.u32 %s175_s25, 2  ;;  %235 = vrot.lane.b32.xlu1 (!%p421_p7), %v584_v4, %s515_s30  ;;  %s516_s3 = smov (!%p421_p7), 1   ;;  %v224_v9 = vcombine.high (!%p421_p7), %v584_v4, %v584_v4 }
  0x16   : > { %s177_s29 = scalar_lea.vmem %s657_s0, %s418_s26  ;;  %226 = vrot.lane.b32.xlu0 (!%p421_p7), %v584_v4, %s516_s3 }
  0x17   : > { %v597_v8 = vld [vmem:[%s177_s29] sm:$0x77] }
  0x19   : > { %237 = vrot.lane.b32.xlu1 (!%p421_p7), %v224_v9, %s515_s30 }
  0x1a   : > { %228 = vrot.lane.b32.xlu0 (!%p421_p7), %v224_v9, %s516_s3 }
  0x87   : > { %v236_v11 = vpop.permute.xlu1 %235 }
  0x88   : > { %v227_v12 = vpop.permute.xlu0 %226 }
  0x8b   : > { %v238_v13 = vpop.permute.xlu1 %237 }
  0x8c   : > { %v229_v14 = vpop.permute.xlu0 %228  ;;  %v239_v15 = vsel %vm217_vm0, %v236_v11, %v238_v13  ;;  %v240_v16 = vsel %vm217_vm0, %v238_v13, %v236_v11 }
  0x8d   : > { %v231_v17 = vsel %vm230_vm3, %v227_v12, %v229_v14  ;;  %v232_v18 = vsel %vm230_vm3, %v229_v14, %v227_v12  ;;  %v241_v19 = vsel %vm217_vm0, 0.0, %v240_v16  ;;  %v248_v20 = vsub.f32 %v239_v15, %v224_v9 }
  0x8e   : > { %v233_v21 = vsel %vm586_vm1, 0.0, %v232_v18  ;;  %v234_v22 = vsel %vm593_vm2, 0.0, %v231_v17  ;;  %v247_v23 = vsub.f32 %v241_v19, %v584_v4 }
  0x8f   : > { %v243_v24 = vsub.f32 %v233_v21, %v584_v4  ;;  %v244_v25 = vsub.f32 %v234_v22, %v224_v9  ;;  %v250_v26 = vand.u32 2147483647, %v248_v20 }
  0x90   : > { %v249_v27 = vand.u32 2147483647, %v247_v23 }
  0x91   : > { %v245_v28 = vand.u32 2147483647, %v243_v24  ;;  %v246_v29 = vand.u32 2147483647, %v244_v25 }
  0x93   : > { %v251_v30 = vadd.f32 %v249_v27, %v245_v28  ;;  %v252_v31 = vadd.f32 %v250_v26, %v246_v29 }
  0x95   : > { %v255_v32 = vcombine.low %v251_v30, %v252_v31 }
  0x97   : > { %257 = vst [vmem:[#allocation2] sm:$0x77] %v255_v32 }
  0x98 PF: > { %s518_s4 = smov 16   ;;  %s519_s5 = smov 1   ;;  %v261_v33 = vcombine.high %v597_v8, %v597_v8  ;;  %vm267_vm4 = vcmp.lt.s32.totalorder %v570_v1, 1  ;;  %v259_v55 = vsub.f32 %v597_v8, %v584_v4  ;;  %v304_v0 = vld [vmem:[#allocation3] sm:$0x77] }
  0x99   : > { %272 = vrot.lane.b32.xlu1 %v597_v8, %s518_s4  ;;  %263 = vrot.lane.b32.xlu0 %v597_v8, %s519_s5  ;;  %p422_p8 = scmp.ne.s32.totalorder %s497_s9, 3 }
  0x9a   : > { %v296_v60 = vmul.f32 %v259_v55, %v259_v55  ;;  %vm316_vm5 = vcmask (!%p422_p8), 1042432   ;;  %vm330_vm6 = vcmask (!%p422_p8), 0  }
  0x9d   : > { %274 = vrot.lane.b32.xlu1 %v261_v33, %s518_s4  ;;  %265 = vrot.lane.b32.xlu0 %v261_v33, %s519_s5 }
  0x9e   : > { %v290_v44 = vld [vmem:[#allocation2] sm:$0x77] }
  0x9f   : > { %v292_v52 = vcombine.high %v290_v44, %v290_v44 }
 0x10b   : > { %v273_v34 = vpop.permute.xlu1 %272  ;;  %v264_v35 = vpop.permute.xlu0 %263 }
 0x10f   : > { %v275_v36 = vpop.permute.xlu1 %274  ;;  %v266_v37 = vpop.permute.xlu0 %265 }
 0x110   : > { %v276_v38 = vsel %vm217_vm0, %v273_v34, %v275_v36  ;;  %v277_v39 = vsel %vm217_vm0, %v275_v36, %v273_v34  ;;  %v268_v40 = vsel %vm267_vm4, %v264_v35, %v266_v37  ;;  %v269_v41 = vsel %vm267_vm4, %v266_v37, %v264_v35 }
 0x111   : > { %v278_v42 = vsel %vm217_vm0, 0.0, %v277_v39  ;;  %v285_v43 = vsub.f32 %v276_v38, %v261_v33  ;;  %v270_v45 = vsel %vm586_vm1, 0.0, %v269_v41  ;;  %v271_v46 = vsel %vm593_vm2, 0.0, %v268_v40 }
 0x112   : > { %v284_v47 = vsub.f32 %v278_v42, %v597_v8  ;;  %v280_v48 = vsub.f32 %v270_v45, %v597_v8  ;;  %v281_v49 = vsub.f32 %v271_v46, %v261_v33 }
 0x113   : > { %v287_v50 = vand.u32 2147483647, %v285_v43 }
 0x114   : > { %v286_v51 = vand.u32 2147483647, %v284_v47  ;;  %v282_v53 = vand.u32 2147483647, %v280_v48  ;;  %v283_v54 = vand.u32 2147483647, %v281_v49 }
 0x116   : > { %v288_v56 = vadd.f32 %v286_v51, %v282_v53  ;;  %v289_v57 = vadd.f32 %v287_v50, %v283_v54 }
 0x118   : > { %v294_v58 = vsub.f32 %v288_v56, %v290_v44  ;;  %v295_v59 = vsub.f32 %v289_v57, %v292_v52 }
 0x11a   : > { %v297_v61 = vand.u32 2147483647, %v294_v58  ;;  %v298_v62 = vand.u32 2147483647, %v295_v59 }
 0x11c   : > { %v301_v63 = vcombine.low %v297_v61, %v298_v62  ;;  %311 = sbr.rel (%p422_p8) target bundleno = 509 (0x1fd), region = 36 }
 0x11e   : > { %v303_v1 = vadd.f32 %v301_v63, %v296_v60 }
 0x120   : > { %v306_v2 = vadd.f32 %v304_v0, %v303_v1 }
 0x122   : > { %307 = vst [vmem:[#allocation3] sm:$0x77] %v306_v2 }
 0x129   : > { %v312_v3 = vld [vmem:[#allocation3] sm:$0x77] }
 0x12a   : > { %v314_v5 = vcombine.high %v312_v3, %v312_v3  ;;  %v317_v4 = vsel %vm316_vm5, %v312_v3, 0.0 }
 0x12c   : > { %v318_v6 = vsel %vm316_vm5, %v314_v5, 0.0 }
 0x12d   : > { %v319_v7 = vadd.f32 %v318_v6, %v317_v4 }
 0x12f   : > { %320 = vadd.xlane.f32.xlu0 %v319_v7 }
 0x1bc   : > { %v321_v8 = vpop.xlane.xlu0 %320 }
 0x1bd   : > { %v322_v9 = vrot.slane %v321_v8, 4 }
 0x1bf   : > { %v323_v10 = vadd.f32 %v322_v9, %v321_v8 }
 0x1c1   : > { %v324_v11 = vrot.slane %v323_v10, 2 }
 0x1c3   : > { %v325_v12 = vadd.f32 %v324_v11, %v323_v10 }
 0x1c5   : > { %v326_v13 = vrot.slane %v325_v12, 1 }
 0x1c7   : > { %v327_v14 = vadd.f32 %v326_v13, %v325_v12 }
 0x1c9   : > { %426 = vpush %v327_v14 }
 0x1fa   : > { %s427_s6 = spop %426 }
 0x1fb   : > { %v329_v15 = vstv %s427_s6 }
 0x1fc   : > { %331 = vst.msk [vmem:[%s185_s20] sm:$0x1] %vm330_vm6, %v329_v15 }
 0x1fd PF: > { %s12_s13 = sadd.s32 1, %s513_s13   ;;  %s664_s9 = smov %s505_s11 }
 0x1fe   : > { %p9_p9 = scmp.ge.s32.totalorder %s12_s13, 10   ;;  %s665_s10 = smov %s509_s12 }
 0x1ff   : > { %s666_s11 = smov %s669_s14  ;;  %s667_s12 = smov %s673_s15 }
 0x200   :  { %11 = sbr.rel (!%p9_p9) target bundleno = 3 (0x3), region = 69 }

</bundles_post_ra>
